<compile_context>
chip_gen: v5e
topology: v5e:2x2
jax: 0.10.0
libtpu: 0.0.40
codegen_flags: <defaults>
</compile_context>

<pallas_src>
import functools
import math

import jax
import jax.numpy as jnp
from jax.experimental import pallas as pl
from jax.experimental.pallas import tpu as pltpu


# ----------------------------------------------------------------------------
# SAGEConv('mean') layer kernel: out = H_self @ W_self + (A @ H) @ W_neigh + b
# ----------------------------------------------------------------------------
def _sage_layer_kernel(apply_relu,
                       counts_ref, kmap_ref,          # scalar-prefetch (SMEM)
                       a_ref, hk_ref, hi_ref,         # bf16 streamed tiles
                       ws_ref, wn_ref, b_ref,         # f32 weights / bias
                       o_ref,                         # f32 output tile
                       acc_ref):                      # f32 VMEM scratch
    i = pl.program_id(0)
    k = pl.program_id(1)

    @pl.when(k == 0)
    def _init():
        acc_ref[...] = jnp.zeros_like(acc_ref)

    # Only accumulate for real (nonzero) adjacency blocks of this row tile.
    @pl.when(k < counts_ref[i])
    def _accum():
        acc_ref[...] += jnp.dot(a_ref[...], hk_ref[...],
                                preferred_element_type=jnp.float32)

    @pl.when(k == pl.num_programs(1) - 1)
    def _finalize():
        h_self = hi_ref[...].astype(jnp.float32)
        out = (jnp.dot(h_self, ws_ref[...], preferred_element_type=jnp.float32)
               + jnp.dot(acc_ref[...], wn_ref[...],
                         preferred_element_type=jnp.float32)
               + b_ref[...])
        if apply_relu:                      # static python branch
            out = jnp.maximum(out, 0.0)
        o_ref[...] = out.astype(o_ref.dtype)


def _pick_tile(n, requested, align=128):
    """Largest t <= requested with t % align == 0 and n % t == 0 (else n)."""
    requested = max(min(requested, n), 1)
    if n % align != 0:
        return n                                  # full-extent block is legal
    t = max((requested // align) * align, align)
    while n % t != 0:
        t -= align
    return t


def _layer_vmem_limit(tm, tk, cin, cout):
    lane = lambda d: ((d + 127) // 128) * 128
    sub = lambda d: ((d + 7) // 8) * 8
    bf16, f32 = 2, 4
    need = 0
    need += 2 * sub(tm) * lane(tk) * bf16                      # A tiles (dbl buf)
    need += 2 * sub(tk) * lane(cin) * bf16                     # neighbor H tiles
    need += 2 * sub(tm) * lane(cin) * bf16                     # self H rows
    need += 2 * (2 * sub(cin) * lane(cout) + lane(cout)) * f32 # weights + bias
    need += 2 * sub(tm) * lane(cout) * f32                     # output tile
    need += sub(tm) * lane(cin) * f32                          # accumulator
    return int(min(64 * 1024 * 1024, max(32 * 1024 * 1024, 2 * need)))


def build_block_sparsity(a_mean, tm, tk):
    """Per row tile: count + padded list of nonzero column-tile indices."""
    n = a_mean.shape[0]
    n_i, n_k = n // tm, n // tk
    blocks = a_mean.reshape(n_i, tm, n_k, tk)
    nz = jnp.abs(blocks).sum(axis=(1, 3)) > 0                  # (n_i, n_k) bool
    counts = nz.sum(axis=1).astype(jnp.int32)
    order = jnp.argsort(jnp.where(nz, 0, 1), axis=1).astype(jnp.int32)
    col = jnp.arange(n_k, dtype=jnp.int32)[None, :]
    last_valid = jnp.take_along_axis(
        order, jnp.maximum(counts - 1, 0)[:, None], axis=1)
    kmap = jnp.where(col < counts[:, None], order, last_valid).astype(jnp.int32)
    k_slots = max(int(counts.max()), 1)
    return counts, kmap[:, :k_slots], k_slots


def sage_layer(a_bf16, counts, kmap, k_slots, h, w_self, w_neigh, b,
               *, apply_relu, tm, tk):
    n, cin = h.shape
    cout = w_self.shape[1]
    n_i = n // tm
    h_bf = h.astype(jnp.bfloat16)
    kernel = functools.partial(_sage_layer_kernel, apply_relu)

    return pl.pallas_call(
        kernel,
        out_shape=jax.ShapeDtypeStruct((n, cout), jnp.float32),
        grid_spec=pltpu.PrefetchScalarGridSpec(
            num_scalar_prefetch=2,
            grid=(n_i, k_slots),
            in_specs=[
                # A row tile, column tile chosen by the sparsity map.
                pl.BlockSpec((tm, tk), lambda i, k, cnt, kmp: (i, kmp[i, k])),
                # Neighbor features for that column tile.
                pl.BlockSpec((tk, cin), lambda i, k, cnt, kmp: (kmp[i, k], 0)),
                # Self features for this row tile.
                pl.BlockSpec((tm, cin), lambda i, k, cnt, kmp: (i, 0)),
                pl.BlockSpec((cin, cout), lambda i, k, cnt, kmp: (0, 0)),
                pl.BlockSpec((cin, cout), lambda i, k, cnt, kmp: (0, 0)),
                pl.BlockSpec((1, cout), lambda i, k, cnt, kmp: (0, 0)),
            ],
            out_specs=pl.BlockSpec((tm, cout), lambda i, k, cnt, kmp: (i, 0)),
            scratch_shapes=[pltpu.VMEM((tm, cin), jnp.float32)],
        ),
        compiler_params=pltpu.CompilerParams(
            dimension_semantics=("parallel", "arbitrary"),
            vmem_limit_bytes=_layer_vmem_limit(tm, tk, cin, cout),
        ),
    )(counts, kmap, a_bf16, h_bf, h_bf, w_self, w_neigh, b)


# ----------------------------------------------------------------------------
# Edge predictor kernel: MLP(h[src] * h[dst]) with two hidden ReLU layers.
# ----------------------------------------------------------------------------
def _predictor_kernel(hs_ref, hd_ref, w1_ref, b1_ref, w2_ref, b2_ref,
                      w3_ref, b3_ref, o_ref):
    e = hs_ref[...] * hd_ref[...]
    x = jnp.maximum(
        jnp.dot(e, w1_ref[...], preferred_element_type=jnp.float32) + b1_ref[...],
        0.0)
    x = jnp.maximum(
        jnp.dot(x, w2_ref[...], preferred_element_type=jnp.float32) + b2_ref[...],
        0.0)
    x = jnp.dot(x, w3_ref[...], preferred_element_type=jnp.float32) + b3_ref[...]
    o_ref[...] = x.astype(o_ref.dtype)


def predictor_forward(h, src, dst, pp, *, te=128):
    # Data-dependent endpoint gather is done in the wrapper (XLA gather);
    # the fused elementwise-product + 3-layer MLP runs in the kernel.
    e = src.shape[0]
    hs = jnp.take(h, src, axis=0)
    hd = jnp.take(h, dst, axis=0)
    e_pad = ((e + te - 1) // te) * te
    if e_pad != e:
        hs = jnp.pad(hs, ((0, e_pad - e), (0, 0)))
        hd = jnp.pad(hd, ((0, e_pad - e), (0, 0)))
    hid = pp["w1"].shape[0]

    out = pl.pallas_call(
        _predictor_kernel,
        out_shape=jax.ShapeDtypeStruct((e_pad, 1), jnp.float32),
        grid_spec=pltpu.PrefetchScalarGridSpec(
            num_scalar_prefetch=0,
            grid=(e_pad // te,),
            in_specs=[
                pl.BlockSpec((te, hid), lambda i: (i, 0)),
                pl.BlockSpec((te, hid), lambda i: (i, 0)),
                pl.BlockSpec((hid, hid), lambda i: (0, 0)),
                pl.BlockSpec((1, hid), lambda i: (0, 0)),
                pl.BlockSpec((hid, hid), lambda i: (0, 0)),
                pl.BlockSpec((1, hid), lambda i: (0, 0)),
                pl.BlockSpec((hid, 1), lambda i: (0, 0)),
                pl.BlockSpec((1, 1), lambda i: (0, 0)),
            ],
            out_specs=pl.BlockSpec((te, 1), lambda i: (i, 0)),
        ),
        compiler_params=pltpu.CompilerParams(
            dimension_semantics=("parallel",),
            vmem_limit_bytes=32 * 1024 * 1024,
        ),
    )(hs, hd, pp["w1"], pp["b1"], pp["w2"], pp["b2"], pp["w3"], pp["b3"])
    return out[:e]


# ----------------------------------------------------------------------------
# Full SAGE forward (full-neighbor blocks == same graph at every layer).
# ----------------------------------------------------------------------------
def sage_forward(a_mean, x, params, pos_src, pos_dst, neg_src, neg_dst,
                 *, tm=512, tk=512, te=128):
    n = x.shape[0]
    # Cap tm so the row grid stays >= 2 (keeps both v7x TensorCores busy).
    tm = _pick_tile(n, min(tm, max(n // 2, 128)))
    tk = _pick_tile(n, tk)
    counts, kmap, k_slots = build_block_sparsity(a_mean, tm, tk)
    a_bf = a_mean.astype(jnp.bfloat16)          # bf16 adjacency stream

    h = x
    n_layers = len(params["layers"])
    for l, lp in enumerate(params["layers"]):
        h = sage_layer(a_bf, counts, kmap, k_slots, h,
                       lp["w_self"], lp["w_neigh"], lp["b"],
                       apply_relu=(l != n_layers - 1), tm=tm, tk=tk)

    h_pos = predictor_forward(h, pos_src, pos_dst, params["predictor"], te=te)
    h_neg = predictor_forward(h, neg_src, neg_dst, params["predictor"], te=te)
    return h_pos, h_neg


# ----------------------------------------------------------------------------
# Parameters, graph construction, pure-JAX reference.
# ----------------------------------------------------------------------------
def _xavier_uniform(key, shape, gain=1.0):
    fan_in, fan_out = shape
    a = gain * math.sqrt(6.0 / (fan_in + fan_out))
    return jax.random.uniform(key, shape, jnp.float32, -a, a)


def init_sage_params(key, in_size, hid_size, num_layers=3):
    keys = jax.random.split(key, 2 * num_layers + 6)
    dims = [in_size] + [hid_size] * num_layers
    layers = []
    ki = 0
    for l in range(num_layers):
        cin, cout = dims[l], dims[l + 1]
        layers.append({
            "w_self": _xavier_uniform(keys[ki], (cin, cout)),
            "w_neigh": _xavier_uniform(keys[ki + 1], (cin, cout)),
            "b": jnp.zeros((1, cout), jnp.float32),
        })
        ki += 2

    def linear(kw, kb, fin, fout):                 # torch Linear, stored (fin, fout)
        bound = 1.0 / math.sqrt(fin)
        w = jax.random.uniform(kw, (fin, fout), jnp.float32, -bound, bound)
        b = jax.random.uniform(kb, (1, fout), jnp.float32, -bound, bound)
        return w, b

    w1, b1 = linear(keys[ki], keys[ki + 1], hid_size, hid_size)
    w2, b2 = linear(keys[ki + 2], keys[ki + 3], hid_size, hid_size)
    w3, b3 = linear(keys[ki + 4], keys[ki + 5], hid_size, 1)
    return {"layers": layers,
            "predictor": {"w1": w1, "b1": b1, "w2": w2, "b2": b2,
                          "w3": w3, "b3": b3}}


def build_mean_adjacency(key, n, p=0.05):
    """Symmetric random graph, no self loops, row-normalized (mean aggregation)."""
    raw = jax.random.bernoulli(key, p, (n, n)).astype(jnp.float32)
    adj = jnp.maximum(raw, raw.T) * (1.0 - jnp.eye(n, dtype=jnp.float32))
    deg = adj.sum(axis=1)
    inv = jnp.where(deg > 0, 1.0 / deg, 0.0)
    return adj * inv[:, None]


def reference_forward(a_mean, x, params, pos_src, pos_dst, neg_src, neg_dst):
    hp = jax.lax.Precision.HIGHEST
    a32 = a_mean.astype(jnp.bfloat16).astype(jnp.float32)   # mirror bf16 stream
    h = x
    n_layers = len(params["layers"])
    for l, lp in enumerate(params["layers"]):
        hb = h.astype(jnp.bfloat16).astype(jnp.float32)
        agg = jnp.dot(a32, hb, precision=hp)
        h = (jnp.dot(hb, lp["w_self"], precision=hp)
             + jnp.dot(agg, lp["w_neigh"], precision=hp) + lp["b"])
        if l != n_layers - 1:
            h = jnp.maximum(h, 0.0)

    def pred(src, dst):
        p = params["predictor"]
        e = h[src] * h[dst]
        z = jnp.maximum(jnp.dot(e, p["w1"], precision=hp) + p["b1"], 0.0)
        z = jnp.maximum(jnp.dot(z, p["w2"], precision=hp) + p["b2"], 0.0)
        return jnp.dot(z, p["w3"], precision=hp) + p["b3"]

    return pred(pos_src, pos_dst), pred(neg_src, neg_dst)


if __name__ == "__main__":
    N = 256
    IN_SIZE, HID_SIZE, NUM_LAYERS = 16, 32, 3
    E_POS, E_NEG = 200, 184

    key = jax.random.PRNGKey(0)
    kg, kx, kp, ke = jax.random.split(key, 4)
    a_mean = build_mean_adjacency(kg, N, p=0.05)
    x = jax.random.normal(kx, (N, IN_SIZE), jnp.float32)
    params = init_sage_params(kp, IN_SIZE, HID_SIZE, NUM_LAYERS)

    ke1, ke2, ke3, ke4 = jax.random.split(ke, 4)
    pos_src = jax.random.randint(ke1, (E_POS,), 0, N)
    pos_dst = jax.random.randint(ke2, (E_POS,), 0, N)
    neg_src = jax.random.randint(ke3, (E_NEG,), 0, N)
    neg_dst = jax.random.randint(ke4, (E_NEG,), 0, N)

    h_pos, h_neg = sage_forward(a_mean, x, params,
                                pos_src, pos_dst, neg_src, neg_dst,
                                tm=128, tk=128, te=128)
    h_pos = jax.block_until_ready(h_pos)
    h_neg = jax.block_until_ready(h_neg)

    r_pos, r_neg = reference_forward(a_mean, x, params,
                                     pos_src, pos_dst, neg_src, neg_dst)
    assert h_pos.shape == (E_POS, 1) and h_neg.shape == (E_NEG, 1)
    assert jnp.allclose(h_pos, r_pos, atol=1e-2, rtol=1e-2), \
        float(jnp.max(jnp.abs(h_pos - r_pos)))
    assert jnp.allclose(h_neg, r_neg, atol=1e-2, rtol=1e-2), \
        float(jnp.max(jnp.abs(h_neg - r_neg)))

    print("KERNEL_OK")
</pallas_src>

<mosaic_0001>
module attributes {stable_mosaic.version = 11 : i64} {
  func.func @_sage_layer_kernel(%arg0: i32, %arg1: i32, %arg2: memref<2xi32, #tpu.memory_space<smem>>, %arg3: memref<2x2xi32, #tpu.memory_space<smem>>, %arg4: memref<128x128xbf16, #tpu.memory_space<vmem>>, %arg5: memref<128x16xbf16, #tpu.memory_space<vmem>>, %arg6: memref<128x16xbf16, #tpu.memory_space<vmem>>, %arg7: memref<16x32xf32, #tpu.memory_space<vmem>>, %arg8: memref<16x32xf32, #tpu.memory_space<vmem>>, %arg9: memref<1x32xf32, #tpu.memory_space<vmem>>, %arg10: memref<128x32xf32, #tpu.memory_space<vmem>>, %arg11: memref<128x16xf32, #tpu.memory_space<vmem>>) attributes {dimension_semantics = [#tpu.dimension_semantics<parallel>, #tpu.dimension_semantics<arbitrary>], iteration_bounds = array<i64: 2, 2>, scalar_prefetch = 2 : i64, scratch_operands = 1 : i64, tpu.core_type = #tpu.core_type<tc>, window_params = [{transform_indices = @transform_0, window_bounds = array<i64: 128, 128>}, {transform_indices = @transform_1, window_bounds = array<i64: 128, 16>}, {transform_indices = @transform_2, window_bounds = array<i64: 128, 16>}, {pipeline_mode = #tpu.pipeline_mode<synchronous>, transform_indices = @transform_3, window_bounds = array<i64: 16, 32>}, {pipeline_mode = #tpu.pipeline_mode<synchronous>, transform_indices = @transform_4, window_bounds = array<i64: 16, 32>}, {pipeline_mode = #tpu.pipeline_mode<synchronous>, transform_indices = @transform_5, window_bounds = array<i64: 1, 32>}, {transform_indices = @transform_6, window_bounds = array<i64: 128, 32>}]} {
    %c0_i32 = arith.constant 0 : i32
    %0 = arith.cmpi eq, %arg1, %c0_i32 : i32
    %1 = arith.extui %0 : i1 to i32
    %c0_i32_0 = arith.constant 0 : i32
    %2 = arith.cmpi ne, %1, %c0_i32_0 : i32
    scf.if %2 {
      %cst = arith.constant 0.000000e+00 : f32
      %11 = vector.broadcast %cst : f32 to vector<128x16xf32>
      %c0 = arith.constant 0 : index
      %c0_3 = arith.constant 0 : index
      %12 = vector.load %arg11[%c0, %c0_3] : memref<128x16xf32, #tpu.memory_space<vmem>>, vector<128x16xf32>
      tpu.vector_store %arg11[%c0, %c0_3], %11 {strides = array<i32>} : memref<128x16xf32, #tpu.memory_space<vmem>>, vector<128x16xf32>,
    } else {
    }
    %3 = arith.index_cast %arg0 : i32 to index
    %4 = memref.load %arg2[%3] : memref<2xi32, #tpu.memory_space<smem>>
    %5 = arith.cmpi slt, %arg1, %4 : i32
    %6 = arith.extui %5 : i1 to i32
    %c0_i32_1 = arith.constant 0 : i32
    %7 = arith.cmpi ne, %6, %c0_i32_1 : i32
    scf.if %7 {
      %c0 = arith.constant 0 : index
      %c0_3 = arith.constant 0 : index
      %11 = vector.load %arg11[%c0, %c0_3] : memref<128x16xf32, #tpu.memory_space<vmem>>, vector<128x16xf32>
      %c0_4 = arith.constant 0 : index
      %c0_5 = arith.constant 0 : index
      %12 = vector.load %arg4[%c0_4, %c0_5] : memref<128x128xbf16, #tpu.memory_space<vmem>>, vector<128x128xbf16>
      %c0_6 = arith.constant 0 : index
      %c0_7 = arith.constant 0 : index
      %13 = vector.load %arg5[%c0_6, %c0_7] : memref<128x16xbf16, #tpu.memory_space<vmem>>, vector<128x16xbf16>
      %cst = arith.constant dense<0.000000e+00> : vector<128x16xf32>
      %14 = tpu.matmul %12, %13, %cst {dimension_numbers = #tpu.dot_dimension_numbers<[1], [0], [0], [1], [0, 0, 1, 1], [], []>} : vector<128x128xbf16>, vector<128x16xbf16>, vector<128x16xf32> -> vector<128x16xf32>
      %15 = arith.addf %11, %14 : vector<128x16xf32>
      %c0_8 = arith.constant 0 : index
      %c0_9 = arith.constant 0 : index
      %16 = vector.load %arg11[%c0_8, %c0_9] : memref<128x16xf32, #tpu.memory_space<vmem>>, vector<128x16xf32>
      tpu.vector_store %arg11[%c0_8, %c0_9], %15 {strides = array<i32>} : memref<128x16xf32, #tpu.memory_space<vmem>>, vector<128x16xf32>,
    } else {
    }
    %c1_i32 = arith.constant 1 : i32
    %8 = arith.cmpi eq, %arg1, %c1_i32 : i32
    %9 = arith.extui %8 : i1 to i32
    %c0_i32_2 = arith.constant 0 : i32
    %10 = arith.cmpi ne, %9, %c0_i32_2 : i32
    scf.if %10 {
      %c0 = arith.constant 0 : index
      %c0_3 = arith.constant 0 : index
      %11 = vector.load %arg6[%c0, %c0_3] : memref<128x16xbf16, #tpu.memory_space<vmem>>, vector<128x16xbf16>
      %12 = arith.extf %11 : vector<128x16xbf16> to vector<128x16xf32>
      %c0_4 = arith.constant 0 : index
      %c0_5 = arith.constant 0 : index
      %13 = vector.load %arg7[%c0_4, %c0_5] : memref<16x32xf32, #tpu.memory_space<vmem>>, vector<16x32xf32>
      %cst = arith.constant dense<0.000000e+00> : vector<128x32xf32>
      %14 = tpu.matmul %12, %13, %cst {dimension_numbers = #tpu.dot_dimension_numbers<[1], [0], [0], [1], [0, 0, 1, 1], [], []>} : vector<128x16xf32>, vector<16x32xf32>, vector<128x32xf32> -> vector<128x32xf32>
      %c0_6 = arith.constant 0 : index
      %c0_7 = arith.constant 0 : index
      %15 = vector.load %arg11[%c0_6, %c0_7] : memref<128x16xf32, #tpu.memory_space<vmem>>, vector<128x16xf32>
      %c0_8 = arith.constant 0 : index
      %c0_9 = arith.constant 0 : index
      %16 = vector.load %arg8[%c0_8, %c0_9] : memref<16x32xf32, #tpu.memory_space<vmem>>, vector<16x32xf32>
      %cst_10 = arith.constant dense<0.000000e+00> : vector<128x32xf32>
      %17 = tpu.matmul %15, %16, %cst_10 {dimension_numbers = #tpu.dot_dimension_numbers<[1], [0], [0], [1], [0, 0, 1, 1], [], []>} : vector<128x16xf32>, vector<16x32xf32>, vector<128x32xf32> -> vector<128x32xf32>
      %18 = arith.addf %14, %17 : vector<128x32xf32>
      %c0_11 = arith.constant 0 : index
      %c0_12 = arith.constant 0 : index
      %19 = vector.load %arg9[%c0_11, %c0_12] : memref<1x32xf32, #tpu.memory_space<vmem>>, vector<1x32xf32>
      %20 = vector.broadcast %19 : vector<1x32xf32> to vector<128x32xf32>
      %21 = arith.addf %18, %20 : vector<128x32xf32>
      %cst_13 = arith.constant 0.000000e+00 : f32
      %22 = vector.broadcast %cst_13 : f32 to vector<128x32xf32>
      %23 = arith.maximumf %21, %22 : vector<128x32xf32>
      %c0_14 = arith.constant 0 : index
      %c0_15 = arith.constant 0 : index
      %24 = vector.load %arg10[%c0_14, %c0_15] : memref<128x32xf32, #tpu.memory_space<vmem>>, vector<128x32xf32>
      tpu.vector_store %arg10[%c0_14, %c0_15], %23 {strides = array<i32>} : memref<128x32xf32, #tpu.memory_space<vmem>>, vector<128x32xf32>,
    } else {
    }
    return
  }
  func.func @transform_0(%arg0: i32, %arg1: i32, %arg2: memref<2xi32, #tpu.memory_space<smem>>, %arg3: memref<2x2xi32, #tpu.memory_space<smem>>) -> (i32, i32) {
    %0 = arith.index_cast %arg0 : i32 to index
    %1 = arith.index_cast %arg1 : i32 to index
    %2 = memref.load %arg3[%0, %1] : memref<2x2xi32, #tpu.memory_space<smem>>
    %c0_i32 = arith.constant 0 : i32
    return %arg0, %2 : i32, i32
  }
  func.func @transform_1(%arg0: i32, %arg1: i32, %arg2: memref<2xi32, #tpu.memory_space<smem>>, %arg3: memref<2x2xi32, #tpu.memory_space<smem>>) -> (i32, i32) {
    %0 = arith.index_cast %arg0 : i32 to index
    %1 = arith.index_cast %arg1 : i32 to index
    %2 = memref.load %arg3[%0, %1] : memref<2x2xi32, #tpu.memory_space<smem>>
    %c0_i32 = arith.constant 0 : i32
    %c0_i32_0 = arith.constant 0 : i32
    return %2, %c0_i32 : i32, i32
  }
  func.func @transform_2(%arg0: i32, %arg1: i32, %arg2: memref<2xi32, #tpu.memory_space<smem>>, %arg3: memref<2x2xi32, #tpu.memory_space<smem>>) -> (i32, i32) {
    %c0_i32 = arith.constant 0 : i32
    %c0_i32_0 = arith.constant 0 : i32
    return %arg0, %c0_i32 : i32, i32
  }
  func.func @transform_3(%arg0: i32, %arg1: i32, %arg2: memref<2xi32, #tpu.memory_space<smem>>, %arg3: memref<2x2xi32, #tpu.memory_space<smem>>) -> (i32, i32) {
    %c0_i32 = arith.constant 0 : i32
    %c0_i32_0 = arith.constant 0 : i32
    %c0_i32_1 = arith.constant 0 : i32
    return %c0_i32, %c0_i32_0 : i32, i32
  }
  func.func @transform_4(%arg0: i32, %arg1: i32, %arg2: memref<2xi32, #tpu.memory_space<smem>>, %arg3: memref<2x2xi32, #tpu.memory_space<smem>>) -> (i32, i32) {
    %c0_i32 = arith.constant 0 : i32
    %c0_i32_0 = arith.constant 0 : i32
    %c0_i32_1 = arith.constant 0 : i32
    return %c0_i32, %c0_i32_0 : i32, i32
  }
  func.func @transform_5(%arg0: i32, %arg1: i32, %arg2: memref<2xi32, #tpu.memory_space<smem>>, %arg3: memref<2x2xi32, #tpu.memory_space<smem>>) -> (i32, i32) {
    %c0_i32 = arith.constant 0 : i32
    %c0_i32_0 = arith.constant 0 : i32
    %c0_i32_1 = arith.constant 0 : i32
    return %c0_i32, %c0_i32_0 : i32, i32
  }
  func.func @transform_6(%arg0: i32, %arg1: i32, %arg2: memref<2xi32, #tpu.memory_space<smem>>, %arg3: memref<2x2xi32, #tpu.memory_space<smem>>) -> (i32, i32) {
    %c0_i32 = arith.constant 0 : i32
    %c0_i32_0 = arith.constant 0 : i32
    return %arg0, %c0_i32 : i32, i32
  }
}

</mosaic_0001>

<bundles_post_ra>
// kernel: tpu_custom_call.1
= control target key start
LH: loop header
LB: loop body
LE: loop exit
PB: predicated region body
PF: predicated region fallthrough
CT: control target
= control target key end

     0   :  { %s1636_s11 = smov [#allocation4]   ;;  %s1637_s12 = smov [#allocation5]   ;;  %s2002_s0 = inlined_call_operand.hbm [shape: s32[2], index: 0, kind: input, shape index: {}]   ;;  %s2003_s2 = inlined_call_operand.vmem [shape: bf16[256,256], index: 2, kind: input, shape index: {}]   ;;  %s2004_s3 = inlined_call_operand.vmem [shape: bf16[256,16], index: 3, kind: input, shape index: {}]   ;;  %s2005_s4 = inlined_call_operand.vmem [shape: bf16[256,16], index: 4, kind: input, shape index: {}]   ;;  %s2006_s5 = inlined_call_operand.vmem [shape: f32[16,32], index: 5, kind: input, shape index: {}]   ;;  %s2007_s6 = inlined_call_operand.hbm [shape: f32[16,32], index: 6, kind: input, shape index: {}]   ;;  %s2008_s7 = inlined_call_operand.vmem [shape: f32[1,32], index: 7, kind: input, shape index: {}]   ;;  %s2009_s8 = inlined_call_operand.vmem [shape: f32[256,32], index: 8, kind: output, shape index: {}]   ;;  %s2010_s1 = inlined_call_operand.hbm [shape: s32[2,2], index: 1, kind: input, shape index: {}]  }
   0x1   :  { %s14_s29 = sshll.u32 %s2002_s0, 4  ;;  %s19_s10 = sshll.u32 %s2010_s1, 4  ;;  %s15_s29 = int_to_ptr.hbm [resolvable:$true] %s14_s29  ;;  %s20_s10 = int_to_ptr.hbm [resolvable:$true] %s19_s10 }
   0x2   :  { %17 = dma.hbm_to_smem %s15_s29, 16, %s1636_s11, [#allocation3] }
   0x3   :  { %22 = dma.hbm_to_smem %s20_s10, 32, %s1637_s12, [#allocation3] }
   0x4   :  { %1602 = dma.done.wait [#allocation3], 48 }
   0x5   :  { %1603 = vsyncadd [#allocation3], 4294967248 }
   0x6   :  { %25 = sfence }
   0x7   :  { %26 = vsyncpa [#allocation8], 0  ;;  %s1693_s13 = smov 0   ;;  %s1695_s14 = smov 0  }
   0x8   :  { %s1697_s15 = smov 0   ;;  %s1699_s0 = smov 0  }
   0x9   :  { %s1701_s16 = smov 0   ;;  %s1703_s1 = smov 0  }
   0xa   :  { %s1705_s17 = smov 0  }
   0xb LB: > { %2014 = sst [smem:[#allocation11_spill]] %s1626_s16  ;;  %s1238_s18 = sadd.s32 4294967295, %s1634_s17   ;;  %s1634_s17 = sphi %s1705_s17, %s32_s17   ;;  %s1630_s1 = sphi %s1703_s1, %s2026_s1   ;;  %s1626_s16 = sphi %s1701_s16, %s2021_s16   ;;  %s1622_s0 = sphi %s1699_s0, %s2025_s0   ;;  %s1618_s15 = sphi %s1697_s15, %s2020_s15   ;;  %s1614_s14 = sphi %s1695_s14, %s2024_s14   ;;  %s1610_s13 = sphi %s1693_s13, %s2023_s13  }
   0xc   : > { %s41_s19 = sadd.s32 1, %s1626_s16  ;;  %s44_s20 = sadd.s32 1, %s1630_s1 }
   0xd   : > { %p42_p0 = scmp.ge.s32.totalorder %s41_s19, 2  ;;  %s48_s21 = sshra.s32 %s1626_s16, 7 }
   0xe   : > { %s53_s22 = sand.u32 127, %s1626_s16  ;;  %s50_s23 = sadd.s32 %s1630_s1, %s48_s21 }
   0xf   : > { %s2028_s19 = smov (%p42_p0, %s41_s19), 0  ;;  %s2030_s20 = smov (!%p42_p0, %s44_s20), %s1630_s1 }
  0x10   : > { %2015 = sst [smem:[#allocation12_spill]] %s2028_s19  ;;  %s56_s24 = sshra.s32 %s2028_s19, 7 }
  0x11   : > { %p46_p1 = scmp.ge.s32.totalorder %s2030_s20, 2  ;;  %s1240_s25 = sshll.u32 %s50_s23, 7 }
  0x12   : > { %s1738_s26 = sadd.s32 %s1240_s25, %s53_s22  ;;  %s61_s27 = sand.u32 127, %s2028_s19 }
  0x13   : > { %s2032_s20 = smov (%p46_p1, %s2030_s20), 0  ;;  %s55_s28 = sld [smem:[#allocation5 + %s1738_s26]] }
  0x14   : > { %2016 = sst [smem:[#allocation13_spill]] %s2032_s20  ;;  %s69_s29 = sadd.s32 1, %s1614_s14 }
  0x15   : > { %s58_s30 = sadd.s32 %s56_s24, %s2032_s20  ;;  %s64_s9 = ssub.s32 %s1630_s1, %s2032_s20 }
  0x16   : > { %s1241_s10 = sshll.u32 %s58_s30, 7  ;;  %p76_p2 = scmp.ne.s32.totalorder %s1614_s14, %s1610_s13 }
  0x17   : > { %s62_s11 = sadd.s32 %s1241_s10, %s61_s27  ;;  %p77_p3 = scmp.eq.s32.totalorder %s1634_s17, 0 }
  0x18   : > { %s63_s12 = sld [smem:[#allocation5 + %s62_s11]]  ;;  %p1244_p4 = scmp.ge.s32.totalorder %s1634_s17, 1 }
  0x19   : > { %p1752_p5 = por %p77_p3, %p76_p2  ;;  %p250_p6 = scmp.lt.s32.totalorder %s1634_s17, 5 }
  0x1a   : > { %p1757_p7 = scmp.eq.s32.totalorder %s1238_s18, 0  ;;  %s264_s27 = sshll.u32 %s2007_s6, 4  ;;  %s265_s27 = int_to_ptr.hbm [resolvable:$true] %s264_s27 }
  0x1b   : > { %p1761_p8 = pnand %p1244_p4, %p250_p6  ;;  %s1638_s30 = smov [#allocation7]  }
  0x1c   : > { %s266_s10 = sshll.u32 %s1638_s30, 4  ;;  %s1639_s19 = smov 128   ;;  %s267_s10 = int_to_ptr.vmem [resolvable:$true] %s266_s10 }
  0x1d   : > { %p1451_p9 = pneg %p1761_p8  ;;  %s1640_s16 = smov 8  }
  0x1e   : > { %s65_s11 = ssub.s32 %s55_s28, %s63_s12  ;;  %p1246_p12 = scmp.ge.s32.totalorder %s1634_s17, 4 }
  0x1f   : > { %s66_s18 = sor.u32 %s65_s11, %s64_s9  ;;  %p1452_p10 = pnand %p1757_p7, %p1451_p9 }
  0x20   : > { %p67_p11 = scmp.eq.s32.totalorder %s66_s18, 0  ;;  %279 = sbr.rel (%p1246_p12) target bundleno = 63 (0x3f), region = 28 }
  0x21   : > { %1454 = dma.hbm_to_vmem [thread:$0]  (!%p1452_p10), %s265_s27, 256, %s267_s10, [#allocation8], %s1639_s19, %s1639_s19, %s1640_s16  }
  0x22   : > { %s1773_s20 = scalar_select %p67_p11, %s1614_s14, %s69_s29  }
  0x25   : > { %282 = sbr.rel (!%p1752_p5) target bundleno = 63 (0x3f), region = 32  ;;  %s294_s28 = sld [smem:[#allocation5 + %s1738_s26]] (%p1752_p5) }
  0x26   : > { %s284_s12 = sand.u32 (%p1752_p5), 1, %s1614_s14   ;;  %s1363_s9 = sshll.u32 (%p1752_p5), %s1630_s1, 5 }
  0x27   : > { %s1247_s24 = sshll.u32 (%p1752_p5), %s284_s12, 6 }
  0x28   : > { %s286_s16 = scalar_lea.vmem (%p1752_p5), [#allocation6], %s1247_s24 }
  0x2b   : > { %s297_s25 = sadd.s32 %s1363_s9, %s294_s28 }
  0x2c   : > { %s1251_s30 = sshll.u32 %s297_s25, 2 }
  0x2d   : > { %s1784_s18 = scalar_lea.vmem %s2003_s2, %s1251_s30 }
  0x2e   : > { %v316_v0 = vld [vmem:[%s1784_s18] sm:$0xf]  ;;  %v318_v1 = vld [vmem:[%s1784_s18 + $0x8] sm:$0xf]  ;;  %v320_v2 = vld [vmem:[%s1784_s18 + $0x10] sm:$0xf] }
  0x2f   : > { %317 = vst [vmem:[%s286_s16] sm:$0xf] %v316_v0  ;;  %v322_v3 = vld [vmem:[%s1784_s18 + $0x18] sm:$0xf]  ;;  %v324_v4 = vld [vmem:[%s1784_s18 + $0x20] sm:$0xf] }
  0x30   : > { %319 = vst [vmem:[%s286_s16 + $0x4] sm:$0xf] %v318_v1  ;;  %v326_v5 = vld [vmem:[%s1784_s18 + $0x28] sm:$0xf]  ;;  %v328_v6 = vld [vmem:[%s1784_s18 + $0x30] sm:$0xf] }
  0x31   : > { %321 = vst [vmem:[%s286_s16 + $0x8] sm:$0xf] %v320_v2  ;;  %v330_v7 = vld [vmem:[%s1784_s18 + $0x38] sm:$0xf]  ;;  %v332_v8 = vld [vmem:[%s1784_s18 + $0x40] sm:$0xf] }
  0x32   : > { %323 = vst [vmem:[%s286_s16 + $0xc] sm:$0xf] %v322_v3  ;;  %v334_v9 = vld [vmem:[%s1784_s18 + $0x48] sm:$0xf]  ;;  %v336_v10 = vld [vmem:[%s1784_s18 + $0x50] sm:$0xf] }
  0x33   : > { %325 = vst [vmem:[%s286_s16 + $0x10] sm:$0xf] %v324_v4  ;;  %v338_v11 = vld [vmem:[%s1784_s18 + $0x58] sm:$0xf]  ;;  %v340_v12 = vld [vmem:[%s1784_s18 + $0x60] sm:$0xf] }
  0x34   : > { %327 = vst [vmem:[%s286_s16 + $0x14] sm:$0xf] %v326_v5  ;;  %v342_v13 = vld [vmem:[%s1784_s18 + $0x68] sm:$0xf]  ;;  %v344_v14 = vld [vmem:[%s1784_s18 + $0x70] sm:$0xf] }
  0x35   : > { %329 = vst [vmem:[%s286_s16 + $0x18] sm:$0xf] %v328_v6  ;;  %v346_v15 = vld [vmem:[%s1784_s18 + $0x78] sm:$0xf] }
  0x36   : > { %331 = vst [vmem:[%s286_s16 + $0x1c] sm:$0xf] %v330_v7 }
  0x37   : > { %333 = vst [vmem:[%s286_s16 + $0x20] sm:$0xf] %v332_v8 }
  0x38   : > { %335 = vst [vmem:[%s286_s16 + $0x24] sm:$0xf] %v334_v9 }
  0x39   : > { %337 = vst [vmem:[%s286_s16 + $0x28] sm:$0xf] %v336_v10 }
  0x3a   : > { %339 = vst [vmem:[%s286_s16 + $0x2c] sm:$0xf] %v338_v11 }
  0x3b   : > { %341 = vst [vmem:[%s286_s16 + $0x30] sm:$0xf] %v340_v12 }
  0x3c   : > { %343 = vst [vmem:[%s286_s16 + $0x34] sm:$0xf] %v342_v13 }
  0x3d   : > { %345 = vst [vmem:[%s286_s16 + $0x38] sm:$0xf] %v344_v14 }
  0x3e   : > { %347 = vst [vmem:[%s286_s16 + $0x3c] sm:$0xf] %v346_v15 }
  0x3f PF: > { %440 = sbr.rel (%p1761_p8) target bundleno = 516 (0x204), region = 81  ;;  %s443_s19 = sand.u32 (!%p1761_p8), 1, %s1610_s13  }
  0x40   : > { %s1253_s26 = sshll.u32 (!%p1761_p8), %s443_s19, 6 }
  0x41   : > { %s1805_s21 = scalar_lea.vmem (!%p1761_p8), [#allocation6], %s1253_s26 }
  0x44   : > { %1605 = dma.done.wait (%p1757_p7), [#allocation8], 256  }
  0x45   : > { %1607 = vsyncadd (%p1757_p7), [#allocation8], 4294967040  ;;  %s504_s27 = sshra.s32 %s1618_s15, 7  ;;  %s509_s10 = sand.u32 127, %s1618_s15 }
  0x46   : > { %s506_s28 = sadd.s32 %s1622_s0, %s504_s27  ;;  %s1258_s23 = sshll.u32 %s1622_s0, 4 }
  0x47   : > { %s1255_s12 = sshll.u32 %s506_s28, 7  ;;  %p527_p13 = scmp.lt.s32.totalorder %s1258_s23, 31 }
  0x48   : > { %s510_s9 = sadd.s32 %s1255_s12, %s509_s10  ;;  %p1262_p1 = scmp.ne.s32.totalorder %s1618_s15, 0 }
  0x49   : > { %s511_s13 = sld [smem:[#allocation5 + %s510_s9]]  ;;  %s2034_s23 = smov (!%p527_p13, %s1258_s23), 31 }
  0x4a   : > { %s1259_s24 = sshll.u32 %s2034_s23, 2  ;;  %s1261_s25 = sshll.u32 %s2034_s23, 3 }
  0x4b   : > { %s1818_s22 = scalar_lea.vmem %s2005_s4, %s1259_s24  ;;  %s1823_s16 = scalar_lea.vmem %s2009_s8, %s1261_s25 }
  0x4f   : > { %s1256_s19 = sshll.u32 %s511_s13, 4 }
  0x50   : > { %p513_p0 = scmp.lt.s32.totalorder %s1256_s19, 31  ;;  %541 = sbr.rel (%p1262_p1) target bundleno = 102 (0x66), region = 93 }
  0x52   : > { %s2036_s19 = smov (!%p513_p0, %s1256_s19), 31 }
  0x53   : > { %s1257_s26 = sshll.u32 %s2036_s19, 2 }
  0x54   : > { %s1828_s28 = scalar_lea.vmem %s2004_s3, %s1257_s26 }
  0x55   : > { %vm542_vm0 = vcmask 130048   ;;  %v1641_v16 = vmov 0.0  }
  0x56   : > { %543 = vst.msk [vmem:[#allocation2] sm:$0xff] %vm542_vm0, %v1641_v16 }
  0x57   : > { %544 = vst.msk [vmem:[#allocation2 + $0x8] sm:$0xff] %vm542_vm0, %v1641_v16 }
  0x58   : > { %545 = vst.msk [vmem:[#allocation2 + $0x10] sm:$0xff] %vm542_vm0, %v1641_v16 }
  0x59   : > { %546 = vst.msk [vmem:[#allocation2 + $0x18] sm:$0xff] %vm542_vm0, %v1641_v16 }
  0x5a   : > { %547 = vst.msk [vmem:[#allocation2 + $0x20] sm:$0xff] %vm542_vm0, %v1641_v16 }
  0x5b   : > { %548 = vst.msk [vmem:[#allocation2 + $0x28] sm:$0xff] %vm542_vm0, %v1641_v16 }
  0x5c   : > { %549 = vst.msk [vmem:[#allocation2 + $0x30] sm:$0xff] %vm542_vm0, %v1641_v16 }
  0x5d   : > { %550 = vst.msk [vmem:[#allocation2 + $0x38] sm:$0xff] %vm542_vm0, %v1641_v16 }
  0x5e   : > { %551 = vst.msk [vmem:[#allocation2 + $0x40] sm:$0xff] %vm542_vm0, %v1641_v16 }
  0x5f   : > { %552 = vst.msk [vmem:[#allocation2 + $0x48] sm:$0xff] %vm542_vm0, %v1641_v16 }
  0x60   : > { %553 = vst.msk [vmem:[#allocation2 + $0x50] sm:$0xff] %vm542_vm0, %v1641_v16 }
  0x61   : > { %554 = vst.msk [vmem:[#allocation2 + $0x58] sm:$0xff] %vm542_vm0, %v1641_v16 }
  0x62   : > { %555 = vst.msk [vmem:[#allocation2 + $0x60] sm:$0xff] %vm542_vm0, %v1641_v16 }
  0x63   : > { %556 = vst.msk [vmem:[#allocation2 + $0x68] sm:$0xff] %vm542_vm0, %v1641_v16 }
  0x64   : > { %557 = vst.msk [vmem:[#allocation2 + $0x70] sm:$0xff] %vm542_vm0, %v1641_v16 }
  0x65   : > { %558 = vst.msk [vmem:[#allocation2 + $0x78] sm:$0xff] %vm542_vm0, %v1641_v16 }
  0x66 PF: > { %s559_s23 = sld [smem:[#allocation4 + %s1622_s0]] }
  0x6c   : > { %p1263_p2 = scmp.ge.s32.totalorder %s1618_s15, %s559_s23 }
  0x6e   : > { %563 = sbr.rel (%p1263_p2) target bundleno = 308 (0x134), region = 97 }
  0x73   : > { %v1379_v17 = vld [vmem:[%s1828_s28 + $0x38] sm:$0xff]  ;;  %v1378_v18 = vld [vmem:[%s1828_s28 + $0x30] sm:$0xff]  ;;  %v1377_v19 = vld [vmem:[%s1828_s28 + $0x28] sm:$0xff]  ;;  %vm773_vm1 = vcmask 130048  }
  0x74   : > { %708 = vmatpush.bf16.msra.mxu0 %v1379_v17  ;;  %1419 = vmatpush.bf16.msra.mxu1 %v1379_v17  ;;  %v1376_v20 = vld [vmem:[%s1828_s28 + $0x20] sm:$0xff]  ;;  %v1375_v21 = vld [vmem:[%s1828_s28 + $0x18] sm:$0xff]  ;;  %v1374_v22 = vld [vmem:[%s1828_s28 + $0x10] sm:$0xff] }
  0x75   : > { %1420 = vmatpush.bf16.msra.mxu2 %v1379_v17  ;;  %1421 = vmatpush.bf16.msra.mxu3 %v1379_v17  ;;  %v1373_v23 = vld [vmem:[%s1828_s28 + $0x8] sm:$0xff]  ;;  %v1372_v24 = vld [vmem:[%s1828_s28] sm:$0xff]  ;;  %v1366_v26 = vld [vmem:[%s1805_s21 + $0x10] sm:$0xff] }
  0x76   : > { %v1364_v25 = vld [vmem:[%s1805_s21] sm:$0xff]  ;;  %v1370_v28 = vld [vmem:[%s1805_s21 + $0x30] sm:$0xff]  ;;  %v1365_v29 = vld [vmem:[%s1805_s21 + $0x8] sm:$0xff] }
  0x77   : > { %v1368_v27 = vld [vmem:[%s1805_s21 + $0x20] sm:$0xff]  ;;  %v1367_v30 = vld [vmem:[%s1805_s21 + $0x18] sm:$0xff]  ;;  %v1369_v31 = vld [vmem:[%s1805_s21 + $0x28] sm:$0xff] }
  0x78   : > { %709 = vmatpush.bf16.msra.mxu0 %v1378_v18  ;;  %1422 = vmatpush.bf16.msra.mxu1 %v1378_v18  ;;  %v1371_v32 = vld [vmem:[%s1805_s21 + $0x38] sm:$0xff]  ;;  %v564_v33 = vld [vmem:[#allocation2] sm:$0xff]  ;;  %v565_v41 = vld [vmem:[#allocation2 + $0x8] sm:$0xff] }
  0x79   : > { %1423 = vmatpush.bf16.msra.mxu2 %v1378_v18  ;;  %1424 = vmatpush.bf16.msra.mxu3 %v1378_v18  ;;  %v568_v34 = vld [vmem:[#allocation2 + $0x20] sm:$0xff]  ;;  %v569_v42 = vld [vmem:[#allocation2 + $0x28] sm:$0xff]  ;;  %v566_v53 = vld [vmem:[#allocation2 + $0x10] sm:$0xff] }
  0x7a   : > { %v572_v39 = vld [vmem:[#allocation2 + $0x40] sm:$0xff]  ;;  %v573_v51 = vld [vmem:[#allocation2 + $0x48] sm:$0xff]  ;;  %v570_v54 = vld [vmem:[#allocation2 + $0x30] sm:$0xff] }
  0x7b   : > { %v576_v40 = vld [vmem:[#allocation2 + $0x60] sm:$0xff]  ;;  %v577_v52 = vld [vmem:[#allocation2 + $0x68] sm:$0xff]  ;;  %v574_v63 = vld [vmem:[#allocation2 + $0x50] sm:$0xff] }
  0x7c   : > { %710 = vmatpush.bf16.msra.mxu0 %v1377_v19  ;;  %1425 = vmatpush.bf16.msra.mxu1 %v1377_v19  ;;  %v578_v0 = vld [vmem:[#allocation2 + $0x70] sm:$0xff]  ;;  %v567_v1 = vld [vmem:[#allocation2 + $0x18] sm:$0xff] }
  0x7d   : > { %1426 = vmatpush.bf16.msra.mxu2 %v1377_v19  ;;  %1427 = vmatpush.bf16.msra.mxu3 %v1377_v19  ;;  %v571_v2 = vld [vmem:[#allocation2 + $0x38] sm:$0xff] }
  0x7e   : > { %v575_v11 = vld [vmem:[#allocation2 + $0x58] sm:$0xff] }
  0x7f   : > { %v579_v12 = vld [vmem:[#allocation2 + $0x78] sm:$0xff] }
  0x80   : > { %711 = vmatpush.bf16.msra.mxu0 %v1376_v20  ;;  %1428 = vmatpush.bf16.msra.mxu1 %v1376_v20 }
  0x81   : > { %1429 = vmatpush.bf16.msra.mxu2 %v1376_v20  ;;  %1430 = vmatpush.bf16.msra.mxu3 %v1376_v20 }
  0x84   : > { %712 = vmatpush.bf16.msra.mxu0 %v1375_v21  ;;  %1431 = vmatpush.bf16.msra.mxu1 %v1375_v21 }
  0x85   : > { %1432 = vmatpush.bf16.msra.mxu2 %v1375_v21  ;;  %1433 = vmatpush.bf16.msra.mxu3 %v1375_v21 }
  0x88   : > { %713 = vmatpush.bf16.msra.mxu0 %v1374_v22  ;;  %1434 = vmatpush.bf16.msra.mxu1 %v1374_v22 }
  0x89   : > { %1435 = vmatpush.bf16.msra.mxu2 %v1374_v22  ;;  %1436 = vmatpush.bf16.msra.mxu3 %v1374_v22 }
  0x8c   : > { %714 = vmatpush.bf16.msra.mxu0 %v1373_v23  ;;  %1437 = vmatpush.bf16.msra.mxu1 %v1373_v23 }
  0x8d   : > { %1438 = vmatpush.bf16.msra.mxu2 %v1373_v23  ;;  %1439 = vmatpush.bf16.msra.mxu3 %v1373_v23 }
  0x90   : > { %715 = vmatpush.bf16.msra.mxu0 %v1372_v24  ;;  %1440 = vmatpush.bf16.msra.mxu1 %v1372_v24 }
  0x91   : > { %1441 = vmatpush.bf16.msra.mxu2 %v1372_v24  ;;  %1442 = vmatpush.bf16.msra.mxu3 %v1372_v24 }
  0x93   : > { %716 = vmatmul.bf16.vlgmr.msra.gmra.mxu0 %v1364_v25  ;;  %726 = vmatmul.bf16.vlgmr.msra.gmra.mxu1 %v1366_v26 }
  0x94   : > { %736 = vmatmul.bf16.vlgmr.msra.gmra.mxu2 %v1368_v27  ;;  %746 = vmatmul.bf16.vlgmr.msra.gmra.mxu3 %v1370_v28 }
  0xa3   : > { %721 = vmatmul.bf16.gmra.mxu0 %v1365_v29  ;;  %731 = vmatmul.bf16.gmra.mxu1 %v1367_v30 }
  0xa4   : > { %741 = vmatmul.bf16.gmra.mxu2 %v1369_v31  ;;  %751 = vmatmul.bf16.gmra.mxu3 %v1371_v32 }
 0x110   : > { %v717_v35 = vpop.f32.mrf.mxu0  ;;  %v727_v36 = vpop.f32.mrf.mxu1 }
 0x111   : > { %v757_v37 = vadd.f32 %v717_v35, %v564_v33  ;;  %v761_v38 = vadd.f32 %v727_v36, %v568_v34 }
 0x113   : > { %774 = vst.msk [vmem:[#allocation2] sm:$0xff] %vm773_vm1, %v757_v37 }
 0x114   : > { %778 = vst.msk [vmem:[#allocation2 + $0x20] sm:$0xff] %vm773_vm1, %v761_v38 }
 0x117   : > { %v737_v43 = vpop.f32.mrf.mxu2  ;;  %v747_v44 = vpop.f32.mrf.mxu3 }
 0x118   : > { %v765_v45 = vadd.f32 %v737_v43, %v572_v39  ;;  %v769_v46 = vadd.f32 %v747_v44, %v576_v40  ;;  %v719_v47 = vpop.f32.mrf.mxu0  ;;  %v729_v48 = vpop.f32.mrf.mxu1 }
 0x119   : > { %v758_v49 = vadd.f32 %v719_v47, %v565_v41  ;;  %v762_v50 = vadd.f32 %v729_v48, %v569_v42 }
 0x11a   : > { %782 = vst.msk [vmem:[#allocation2 + $0x40] sm:$0xff] %vm773_vm1, %v765_v45 }
 0x11b   : > { %786 = vst.msk [vmem:[#allocation2 + $0x60] sm:$0xff] %vm773_vm1, %v769_v46 }
 0x11c   : > { %775 = vst.msk [vmem:[#allocation2 + $0x8] sm:$0xff] %vm773_vm1, %v758_v49 }
 0x11d   : > { %779 = vst.msk [vmem:[#allocation2 + $0x28] sm:$0xff] %vm773_vm1, %v762_v50 }
 0x11f   : > { %v739_v55 = vpop.f32.mrf.mxu2  ;;  %v749_v56 = vpop.f32.mrf.mxu3 }
 0x120   : > { %v766_v57 = vadd.f32 %v739_v55, %v573_v51  ;;  %v770_v58 = vadd.f32 %v749_v56, %v577_v52  ;;  %v722_v59 = vpop.f32.mrf.mxu0  ;;  %v732_v60 = vpop.f32.mrf.mxu1 }
 0x121   : > { %v759_v61 = vadd.f32 %v722_v59, %v566_v53  ;;  %v763_v62 = vadd.f32 %v732_v60, %v570_v54 }
 0x122   : > { %783 = vst.msk [vmem:[#allocation2 + $0x48] sm:$0xff] %vm773_vm1, %v766_v57 }
 0x123   : > { %787 = vst.msk [vmem:[#allocation2 + $0x68] sm:$0xff] %vm773_vm1, %v770_v58 }
 0x124   : > { %776 = vst.msk [vmem:[#allocation2 + $0x10] sm:$0xff] %vm773_vm1, %v759_v61 }
 0x125   : > { %780 = vst.msk [vmem:[#allocation2 + $0x30] sm:$0xff] %vm773_vm1, %v763_v62 }
 0x127   : > { %v742_v3 = vpop.f32.mrf.mxu2  ;;  %v752_v4 = vpop.f32.mrf.mxu3 }
 0x128   : > { %v767_v5 = vadd.f32 %v742_v3, %v574_v63  ;;  %v771_v6 = vadd.f32 %v752_v4, %v578_v0  ;;  %v724_v7 = vpop.f32.mrf.mxu0  ;;  %v734_v8 = vpop.f32.mrf.mxu1 }
 0x129   : > { %v760_v9 = vadd.f32 %v724_v7, %v567_v1  ;;  %v764_v10 = vadd.f32 %v734_v8, %v571_v2 }
 0x12a   : > { %784 = vst.msk [vmem:[#allocation2 + $0x50] sm:$0xff] %vm773_vm1, %v767_v5 }
 0x12b   : > { %788 = vst.msk [vmem:[#allocation2 + $0x70] sm:$0xff] %vm773_vm1, %v771_v6 }
 0x12c   : > { %777 = vst.msk [vmem:[#allocation2 + $0x18] sm:$0xff] %vm773_vm1, %v760_v9 }
 0x12d   : > { %781 = vst.msk [vmem:[#allocation2 + $0x38] sm:$0xff] %vm773_vm1, %v764_v10 }
 0x12f   : > { %v744_v13 = vpop.f32.mrf.mxu2  ;;  %v754_v14 = vpop.f32.mrf.mxu3 }
 0x130   : > { %v768_v15 = vadd.f32 %v744_v13, %v575_v11  ;;  %v772_v16 = vadd.f32 %v754_v14, %v579_v12 }
 0x132   : > { %785 = vst.msk [vmem:[#allocation2 + $0x58] sm:$0xff] %vm773_vm1, %v768_v15 }
 0x133   : > { %789 = vst.msk [vmem:[#allocation2 + $0x78] sm:$0xff] %vm773_vm1, %v772_v16 }
 0x134 PF: > { %p1328_p3 = scmp.ne.s32.totalorder %s1618_s15, 1 }
 0x136   : > { %793 = sbr.rel (%p1328_p3) target bundleno = 516 (0x204), region = 101 }
 0x13b   : > { %v845_v17 = vld [vmem:[#allocation7 + $0x8] sm:$0xff]  ;;  %v844_v19 = vld [vmem:[#allocation7] sm:$0xff]  ;;  %vm846_vm2 = vcmask 130048   ;;  %v838_v34 = vld [vmem:[#allocation2 + $0x50] sm:$0xff]  ;;  %vm1109_vm3 = vcmask 261120  }
 0x13c   : > { %v827_v18 = vld [vmem:[%s2006_s5 + $0x8] sm:$0xff]  ;;  %1443 = vmatpush.msra.mxu2 %v845_v17  ;;  %v826_v20 = vld [vmem:[%s2006_s5] sm:$0xff]  ;;  %909 = vmatpush.msra.mxu0 %v845_v17  ;;  %v830_v36 = vld [vmem:[#allocation2 + $0x10] sm:$0xff] }
 0x13d   : > { %1445 = vmatpush.msra.mxu3 %v827_v18  ;;  %v836_v21 = vld [vmem:[#allocation2 + $0x40] sm:$0xff]  ;;  %1022 = vmatpush.msra.mxu1 %v827_v18  ;;  %v837_v28 = vld [vmem:[#allocation2 + $0x48] sm:$0xff]  ;;  %v839_v38 = vld [vmem:[#allocation2 + $0x58] sm:$0xff] }
 0x13e   : > { %v1415_v22 = vld [vmem:[%s1818_s22 + $0x20] sm:$0xff]   ;;  %1444 = vmatpush.msra.mxu2 %v844_v19  ;;  %910 = vmatpush.msra.mxu0 %v844_v19  ;;  %v829_v30 = vld [vmem:[#allocation2 + $0x8] sm:$0xff]  ;;  %v831_v40 = vld [vmem:[#allocation2 + $0x18] sm:$0xff] }
 0x13f   : > { %v1398_v23 = vunpack.c.l.bf16 %v1415_v22  ;;  %v1381_v24 = vld [vmem:[%s1818_s22] sm:$0xff]   ;;  %1446 = vmatpush.msra.mxu3 %v826_v20  ;;  %1337 = vmatmul.msk.f32.vlgmr.msra.gmra.mxu2 %vm846_vm2, %v836_v21  ;;  %v1399_v27 = vunpack.c.h.bf16 %v1415_v22  ;;  %v1416_v31 = vld [vmem:[%s1818_s22 + $0x28] sm:$0xff]   ;;  %v1417_v41 = vld [vmem:[%s1818_s22 + $0x30] sm:$0xff]  }
 0x140   : > { %v828_v25 = vld [vmem:[#allocation2] sm:$0xff]  ;;  %v1382_v26 = vunpack.c.l.bf16 %v1381_v24  ;;  %1023 = vmatpush.msra.mxu1 %v826_v20  ;;  %v1383_v29 = vunpack.c.h.bf16 %v1381_v24  ;;  %v1412_v32 = vld [vmem:[%s1818_s22 + $0x8] sm:$0xff]   ;;  %v1402_v33 = vunpack.c.l.bf16 %v1416_v31  ;;  %v1403_v37 = vunpack.c.h.bf16 %v1416_v31  ;;  %v1413_v42 = vld [vmem:[%s1818_s22 + $0x10] sm:$0xff]  }
 0x141   : > { %1353 = vmatmul.msk.f32.vlgmr.msra.gmra.mxu3 %vm846_vm2, %v1398_v23  ;;  %1329 = vmatmul.msk.f32.vlgmr.msra.gmra.mxu0 %vm846_vm2, %v828_v25  ;;  %v1386_v35 = vunpack.c.l.bf16 %v1412_v32  ;;  %v1387_v39 = vunpack.c.h.bf16 %v1412_v32  ;;  %v1406_v43 = vunpack.c.l.bf16 %v1417_v41  ;;  %v840_v44 = vld [vmem:[#allocation2 + $0x60] sm:$0xff]  ;;  %v1390_v45 = vunpack.c.l.bf16 %v1413_v42  ;;  %v841_v48 = vld [vmem:[#allocation2 + $0x68] sm:$0xff]  ;;  %v1418_v51 = vld [vmem:[%s1818_s22 + $0x38] sm:$0xff]  }
 0x142   : > { %1345 = vmatmul.msk.f32.vlgmr.msra.gmra.mxu1 %vm846_vm2, %v1382_v26  ;;  %v832_v46 = vld [vmem:[#allocation2 + $0x20] sm:$0xff]  ;;  %v1407_v47 = vunpack.c.h.bf16 %v1417_v41  ;;  %v1391_v49 = vunpack.c.h.bf16 %v1413_v42  ;;  %v833_v50 = vld [vmem:[#allocation2 + $0x28] sm:$0xff]  ;;  %v1414_v52 = vld [vmem:[%s1818_s22 + $0x18] sm:$0xff]   ;;  %v1410_v53 = vunpack.c.l.bf16 %v1418_v51  ;;  %v1411_v57 = vunpack.c.h.bf16 %v1418_v51 }
 0x143   : > { %v842_v54 = vld [vmem:[#allocation2 + $0x70] sm:$0xff]  ;;  %v1394_v55 = vunpack.c.l.bf16 %v1414_v52  ;;  %v843_v58 = vld [vmem:[#allocation2 + $0x78] sm:$0xff]  ;;  %v1395_v59 = vunpack.c.h.bf16 %v1414_v52  ;;  %v1931_v61 = vld [vmem:[%s2008_s7] ss:$0 sm:$0xff] }
 0x144   : > { %v834_v56 = vld [vmem:[#allocation2 + $0x30] sm:$0xff]  ;;  %v835_v60 = vld [vmem:[#allocation2 + $0x38] sm:$0xff] }
 0x147   : > { %1338 = vmatmul.msk.f32.gmra.mxu2 %vm846_vm2, %v837_v28 }
 0x149   : > { %1354 = vmatmul.msk.f32.gmra.mxu3 %vm846_vm2, %v1399_v27  ;;  %1330 = vmatmul.msk.f32.gmra.mxu0 %vm846_vm2, %v829_v30 }
 0x14a   : > { %1346 = vmatmul.msk.f32.gmra.mxu1 %vm846_vm2, %v1383_v29 }
 0x14f   : > { %1339 = vmatmul.msk.f32.gmra.mxu2 %vm846_vm2, %v838_v34 }
 0x151   : > { %1355 = vmatmul.msk.f32.gmra.mxu3 %vm846_vm2, %v1402_v33  ;;  %1331 = vmatmul.msk.f32.gmra.mxu0 %vm846_vm2, %v830_v36 }
 0x152   : > { %1347 = vmatmul.msk.f32.gmra.mxu1 %vm846_vm2, %v1386_v35 }
 0x157   : > { %1340 = vmatmul.msk.f32.gmra.mxu2 %vm846_vm2, %v839_v38 }
 0x159   : > { %1356 = vmatmul.msk.f32.gmra.mxu3 %vm846_vm2, %v1403_v37  ;;  %1332 = vmatmul.msk.f32.gmra.mxu0 %vm846_vm2, %v831_v40 }
 0x15a   : > { %1348 = vmatmul.msk.f32.gmra.mxu1 %vm846_vm2, %v1387_v39 }
 0x15f   : > { %1341 = vmatmul.msk.f32.gmra.mxu2 %vm846_vm2, %v840_v44 }
 0x161   : > { %1357 = vmatmul.msk.f32.gmra.mxu3 %vm846_vm2, %v1406_v43  ;;  %1333 = vmatmul.msk.f32.gmra.mxu0 %vm846_vm2, %v832_v46 }
 0x162   : > { %1349 = vmatmul.msk.f32.gmra.mxu1 %vm846_vm2, %v1390_v45 }
 0x167   : > { %1342 = vmatmul.msk.f32.gmra.mxu2 %vm846_vm2, %v841_v48 }
 0x169   : > { %1358 = vmatmul.msk.f32.gmra.mxu3 %vm846_vm2, %v1407_v47  ;;  %1334 = vmatmul.msk.f32.gmra.mxu0 %vm846_vm2, %v833_v50 }
 0x16a   : > { %1350 = vmatmul.msk.f32.gmra.mxu1 %vm846_vm2, %v1391_v49 }
 0x16f   : > { %1343 = vmatmul.msk.f32.gmra.mxu2 %vm846_vm2, %v842_v54 }
 0x171   : > { %1359 = vmatmul.msk.f32.gmra.mxu3 %vm846_vm2, %v1410_v53  ;;  %1335 = vmatmul.msk.f32.gmra.mxu0 %vm846_vm2, %v834_v56 }
 0x172   : > { %1351 = vmatmul.msk.f32.gmra.mxu1 %vm846_vm2, %v1394_v55 }
 0x177   : > { %1344 = vmatmul.msk.f32.gmra.mxu2 %vm846_vm2, %v843_v58 }
 0x179   : > { %1360 = vmatmul.msk.f32.gmra.mxu3 %vm846_vm2, %v1411_v57  ;;  %1336 = vmatmul.msk.f32.gmra.mxu0 %vm846_vm2, %v835_v60 }
 0x17a   : > { %1352 = vmatmul.msk.f32.gmra.mxu1 %vm846_vm2, %v1395_v59 }
 0x1be   : > { %v912_v62 = vpop.f32.mrf.mxu0 }
 0x1bf   : > { %v1025_v63 = vpop.f32.mrf.mxu1 }
 0x1c0   : > { %v1026_v0 = vadd.f32 %v1025_v63, %v912_v62 }
 0x1c2   : > { %v1077_v1 = vadd.f32 %v1931_v61, %v1026_v0  ;;  %v936_v2 = vpop.f32.mrf.mxu2 }
 0x1c4   : > { %v1049_v3 = vpop.f32.mrf.mxu3  ;;  %v1093_v4 = vmax.f32 %v1077_v1, 0.0 }
 0x1c5   : > { %v1050_v5 = vadd.f32 %v1049_v3, %v936_v2 }
 0x1c6   : > { %1110 = vst.msk [vmem:[%s1823_s16] sm:$0xff] %vm1109_vm3, %v1093_v4  ;;  %v915_v7 = vpop.f32.mrf.mxu0 }
 0x1c7   : > { %v1085_v6 = vadd.f32 %v1931_v61, %v1050_v5  ;;  %v1028_v8 = vpop.f32.mrf.mxu1 }
 0x1c8   : > { %v1029_v10 = vadd.f32 %v1028_v8, %v915_v7 }
 0x1c9   : > { %v1101_v9 = vmax.f32 %v1085_v6, 0.0 }
 0x1ca   : > { %v1078_v11 = vadd.f32 %v1931_v61, %v1029_v10  ;;  %v939_v12 = vpop.f32.mrf.mxu2 }
 0x1cb   : > { %1118 = vst.msk [vmem:[%s1823_s16 + $0x40] sm:$0xff] %vm1109_vm3, %v1101_v9 }
 0x1cc   : > { %v1052_v13 = vpop.f32.mrf.mxu3  ;;  %v1094_v14 = vmax.f32 %v1078_v11, 0.0 }
 0x1cd   : > { %v1053_v15 = vadd.f32 %v1052_v13, %v939_v12 }
 0x1ce   : > { %1111 = vst.msk [vmem:[%s1823_s16 + $0x8] sm:$0xff] %vm1109_vm3, %v1094_v14  ;;  %v918_v17 = vpop.f32.mrf.mxu0 }
 0x1cf   : > { %v1086_v16 = vadd.f32 %v1931_v61, %v1053_v15  ;;  %v1031_v18 = vpop.f32.mrf.mxu1 }
 0x1d0   : > { %v1032_v20 = vadd.f32 %v1031_v18, %v918_v17 }
 0x1d1   : > { %v1102_v19 = vmax.f32 %v1086_v16, 0.0 }
 0x1d2   : > { %v1079_v21 = vadd.f32 %v1931_v61, %v1032_v20  ;;  %v942_v22 = vpop.f32.mrf.mxu2 }
 0x1d3   : > { %1119 = vst.msk [vmem:[%s1823_s16 + $0x48] sm:$0xff] %vm1109_vm3, %v1102_v19 }
 0x1d4   : > { %v1055_v23 = vpop.f32.mrf.mxu3  ;;  %v1095_v24 = vmax.f32 %v1079_v21, 0.0 }
 0x1d5   : > { %v1056_v25 = vadd.f32 %v1055_v23, %v942_v22 }
 0x1d6   : > { %1112 = vst.msk [vmem:[%s1823_s16 + $0x10] sm:$0xff] %vm1109_vm3, %v1095_v24  ;;  %v921_v27 = vpop.f32.mrf.mxu0 }
 0x1d7   : > { %v1087_v26 = vadd.f32 %v1931_v61, %v1056_v25  ;;  %v1034_v28 = vpop.f32.mrf.mxu1 }
 0x1d8   : > { %v1035_v30 = vadd.f32 %v1034_v28, %v921_v27 }
 0x1d9   : > { %v1103_v29 = vmax.f32 %v1087_v26, 0.0 }
 0x1da   : > { %v1080_v31 = vadd.f32 %v1931_v61, %v1035_v30  ;;  %v945_v32 = vpop.f32.mrf.mxu2 }
 0x1db   : > { %1120 = vst.msk [vmem:[%s1823_s16 + $0x50] sm:$0xff] %vm1109_vm3, %v1103_v29 }
 0x1dc   : > { %v1058_v33 = vpop.f32.mrf.mxu3  ;;  %v1096_v34 = vmax.f32 %v1080_v31, 0.0 }
 0x1dd   : > { %v1059_v35 = vadd.f32 %v1058_v33, %v945_v32 }
 0x1de   : > { %1113 = vst.msk [vmem:[%s1823_s16 + $0x18] sm:$0xff] %vm1109_vm3, %v1096_v34  ;;  %v924_v37 = vpop.f32.mrf.mxu0 }
 0x1df   : > { %v1088_v36 = vadd.f32 %v1931_v61, %v1059_v35  ;;  %v1037_v38 = vpop.f32.mrf.mxu1 }
 0x1e0   : > { %v1038_v40 = vadd.f32 %v1037_v38, %v924_v37 }
 0x1e1   : > { %v1104_v39 = vmax.f32 %v1088_v36, 0.0 }
 0x1e2   : > { %v1081_v41 = vadd.f32 %v1931_v61, %v1038_v40  ;;  %v948_v42 = vpop.f32.mrf.mxu2 }
 0x1e3   : > { %1121 = vst.msk [vmem:[%s1823_s16 + $0x58] sm:$0xff] %vm1109_vm3, %v1104_v39 }
 0x1e4   : > { %v1061_v43 = vpop.f32.mrf.mxu3  ;;  %v1097_v44 = vmax.f32 %v1081_v41, 0.0 }
 0x1e5   : > { %v1062_v45 = vadd.f32 %v1061_v43, %v948_v42 }
 0x1e6   : > { %1114 = vst.msk [vmem:[%s1823_s16 + $0x20] sm:$0xff] %vm1109_vm3, %v1097_v44  ;;  %v927_v47 = vpop.f32.mrf.mxu0 }
 0x1e7   : > { %v1089_v46 = vadd.f32 %v1931_v61, %v1062_v45  ;;  %v1040_v48 = vpop.f32.mrf.mxu1 }
 0x1e8   : > { %v1041_v50 = vadd.f32 %v1040_v48, %v927_v47 }
 0x1e9   : > { %v1105_v49 = vmax.f32 %v1089_v46, 0.0 }
 0x1ea   : > { %v1082_v51 = vadd.f32 %v1931_v61, %v1041_v50  ;;  %v951_v52 = vpop.f32.mrf.mxu2 }
 0x1eb   : > { %1122 = vst.msk [vmem:[%s1823_s16 + $0x60] sm:$0xff] %vm1109_vm3, %v1105_v49 }
 0x1ec   : > { %v1064_v53 = vpop.f32.mrf.mxu3  ;;  %v1098_v54 = vmax.f32 %v1082_v51, 0.0 }
 0x1ed   : > { %v1065_v55 = vadd.f32 %v1064_v53, %v951_v52 }
 0x1ee   : > { %1115 = vst.msk [vmem:[%s1823_s16 + $0x28] sm:$0xff] %vm1109_vm3, %v1098_v54  ;;  %v930_v57 = vpop.f32.mrf.mxu0 }
 0x1ef   : > { %v1090_v56 = vadd.f32 %v1931_v61, %v1065_v55  ;;  %v1043_v58 = vpop.f32.mrf.mxu1 }
 0x1f0   : > { %v1044_v60 = vadd.f32 %v1043_v58, %v930_v57 }
 0x1f1   : > { %v1106_v59 = vmax.f32 %v1090_v56, 0.0 }
 0x1f2   : > { %v1083_v62 = vadd.f32 %v1931_v61, %v1044_v60  ;;  %v954_v63 = vpop.f32.mrf.mxu2 }
 0x1f3   : > { %1123 = vst.msk [vmem:[%s1823_s16 + $0x68] sm:$0xff] %vm1109_vm3, %v1106_v59 }
 0x1f4   : > { %v1067_v0 = vpop.f32.mrf.mxu3  ;;  %v1099_v1 = vmax.f32 %v1083_v62, 0.0 }
 0x1f5   : > { %v1068_v2 = vadd.f32 %v1067_v0, %v954_v63 }
 0x1f6   : > { %1116 = vst.msk [vmem:[%s1823_s16 + $0x30] sm:$0xff] %vm1109_vm3, %v1099_v1  ;;  %v933_v4 = vpop.f32.mrf.mxu0 }
 0x1f7   : > { %v1091_v3 = vadd.f32 %v1931_v61, %v1068_v2  ;;  %v1046_v5 = vpop.f32.mrf.mxu1 }
 0x1f8   : > { %v1047_v7 = vadd.f32 %v1046_v5, %v933_v4 }
 0x1f9   : > { %v1107_v6 = vmax.f32 %v1091_v3, 0.0 }
 0x1fa   : > { %v1084_v8 = vadd.f32 %v1931_v61, %v1047_v7  ;;  %v957_v9 = vpop.f32.mrf.mxu2 }
 0x1fb   : > { %1124 = vst.msk [vmem:[%s1823_s16 + $0x70] sm:$0xff] %vm1109_vm3, %v1107_v6 }
 0x1fc   : > { %v1070_v10 = vpop.f32.mrf.mxu3  ;;  %v1100_v11 = vmax.f32 %v1084_v8, 0.0 }
 0x1fd   : > { %v1071_v12 = vadd.f32 %v1070_v10, %v957_v9 }
 0x1fe   : > { %1117 = vst.msk [vmem:[%s1823_s16 + $0x38] sm:$0xff] %vm1109_vm3, %v1100_v11 }
 0x1ff   : > { %v1092_v13 = vadd.f32 %v1931_v61, %v1071_v12 }
 0x201   : > { %v1108_v14 = vmax.f32 %v1092_v13, 0.0 }
 0x203   : > { %1125 = vst.msk [vmem:[%s1823_s16 + $0x78] sm:$0xff] %vm1109_vm3, %v1108_v14 }
 0x204 PF: > { %s32_s17 = sadd.s32 1, %s1634_s17   ;;  %s2020_s15 = sld [smem:[#allocation11_spill]] }
 0x205   : > { %p29_p4 = scmp.ge.s32.totalorder %s32_s17, 6   ;;  %s2021_s16 = sld [smem:[#allocation12_spill]] }
 0x206   : > { %s2022_s24 = sld [smem:[#allocation13_spill]]  ;;  %s2023_s13 = smov %s1614_s14 }
 0x207   : > { %s2024_s14 = smov %s1773_s20  ;;  %s2025_s0 = smov %s1630_s1 }
 0x208   :  { %31 = sbr.rel (!%p29_p4) target bundleno = 11 (0xb), region = 143 }
 0x20c   : > { %s2026_s1 = smov %s2022_s24 }
 0x20d   :  { %1148 = vsyncpa [#allocation8], 1 }
 0x20e   :  { %1150 = vsyncpa [#allocation8 + $0x1], 1 }

</bundles_post_ra>
